<compile_context>
chip_gen: v6e
topology: v6e:2x2x1
jax: 0.10.0
libtpu: 0.0.40
codegen_flags: <defaults>
</compile_context>

<pallas_src>
import jax
import jax.numpy as jnp
from jax.experimental import pallas as pl
from jax.experimental.pallas import tpu as pltpu


# ---------------------------------------------------------------------------
# Pallas kernel.
# Blocks: h/r/t = [3*dim, tb] (components stacked on sublanes, batch on lanes),
# output = [1, tb] (lane-dense).  Tail is pre-packed in reversed component
# order so the single elementwise product aligns h1*r1*t3 | h2*r2*t2 | h3*r3*t1.
# ---------------------------------------------------------------------------
def _trivec_score_kernel(h_ref, r_ref, t_ref, o_ref):
    p = h_ref[...] * r_ref[...] * t_ref[...]          # one fused VALU chain
    o_ref[...] = jnp.sum(p, axis=0, keepdims=True)    # ONE sublane reduction -> (1, tb)


def trivec_score_pallas(h_t, r_t, t_t, *, tb=128):
    """Score a batch of triples.

    Args:
      h_t, r_t, t_t: float32 [3*dim, B] packed/transposed embedding slices
        (batch on the last/lane axis; B must be a multiple of `tb`).
      tb: batch tile (lane) size, multiple of 128.  128 is fine for small
        batches; 512-1024 pays off for large ones (bigger DMAs, still only a
        few MiB of double-buffered VMEM at dim=32).

    Returns:
      float32 [B] scores.
    """
    td, b = h_t.shape
    assert b % tb == 0 and tb % 128 == 0, (b, tb)

    in_spec = pl.BlockSpec((td, tb), lambda i: (0, i))
    out_spec = pl.BlockSpec((1, tb), lambda i: (0, i))

    out = pl.pallas_call(
        _trivec_score_kernel,
        out_shape=jax.ShapeDtypeStruct((1, b), jnp.float32),
        grid=(b // tb,),
        in_specs=[in_spec, in_spec, in_spec],
        out_specs=out_spec,
        compiler_params=pltpu.CompilerParams(
            # Independent batch tiles -> shards across the two v7x TensorCores;
            # measured near-neutral (no downside) on v5e/v6e.
            dimension_semantics=("parallel",),
            # Explicit, generation-safe budget (v7x physical VMEM is 64 MiB).
            # Actual double-buffered footprint is ~ 3 * 2 * td * tb * 4 bytes.
            vmem_limit_bytes=32 * 1024 * 1024,
        ),
    )(h_t, r_t, t_t)
    return out[0]


# ---------------------------------------------------------------------------
# TriVec module (JAX): parameters initialized deterministically in-script.
# ---------------------------------------------------------------------------
class TriVecJax:
    def __init__(self, ent_total: int, rel_total: int, dim: int = 32, seed: int = 0):
        self.dim = dim
        self.ent_total = ent_total
        self.rel_total = rel_total
        self.regularization_const = 0.03

        key = jax.random.PRNGKey(seed)
        ks = jax.random.split(key, 6)
        init = lambda k, n: jax.random.normal(k, (n, dim), dtype=jnp.float32) * 0.1
        # Canonical parameters (mirror the six nn.Embedding tables).
        self.ent_1 = init(ks[0], ent_total)
        self.ent_2 = init(ks[1], ent_total)
        self.ent_3 = init(ks[2], ent_total)
        self.rel_1 = init(ks[3], rel_total)
        self.rel_2 = init(ks[4], rel_total)
        self.rel_3 = init(ks[5], rel_total)

        # Packed + transposed views for the kernel path: [3*dim, N] so the
        # gathered batch lands on the 128-lane axis.  The tail view is stored
        # in reversed component order (3,2,1).
        self.ent_head_t = jnp.concatenate(
            [self.ent_1, self.ent_2, self.ent_3], axis=1).T   # [3*dim, ent_total]
        self.ent_tail_t = jnp.concatenate(
            [self.ent_3, self.ent_2, self.ent_1], axis=1).T   # [3*dim, ent_total]
        self.rel_t = jnp.concatenate(
            [self.rel_1, self.rel_2, self.rel_3], axis=1).T   # [3*dim, rel_total]

    @staticmethod
    def _get_indexes_from_data(data):
        # columns: (head, relation, tail) — matches the PyTorch module.
        return data[:, 0], data[:, 2], data[:, 1]

    def forward(self, data, *, tb=128):
        h_idx, t_idx, r_idx = self._get_indexes_from_data(data)
        b = h_idx.shape[0]
        b_pad = ((b + tb - 1) // tb) * tb
        if b_pad != b:
            pad = b_pad - b
            h_idx = jnp.pad(h_idx, (0, pad))
            t_idx = jnp.pad(t_idx, (0, pad))
            r_idx = jnp.pad(r_idx, (0, pad))

        # Embedding gathers stay in XLA glue: 3 gathers (packed tables) instead
        # of 9, each producing a lane-major [3*dim, b_pad] slab for the kernel.
        # TODO(synk): fold the gather into the kernel (PrefetchScalarGridSpec +
        # pl.Element row map) or enable allow_input_fusion to drop the extra
        # HBM pass over the gathered slabs on bandwidth-bound v5e/v6e.
        h_t = jnp.take(self.ent_head_t, h_idx, axis=1)
        t_t = jnp.take(self.ent_tail_t, t_idx, axis=1)
        r_t = jnp.take(self.rel_t, r_idx, axis=1)

        score = trivec_score_pallas(h_t, r_t, t_t, tb=tb)
        return score[:b]

    # Pure-JAX reference (mirrors the PyTorch get_score) for verification.
    def forward_ref(self, data):
        h_idx, t_idx, r_idx = self._get_indexes_from_data(data)
        take = lambda tbl, idx: jnp.take(tbl, idx, axis=0)
        h1, h2, h3 = take(self.ent_1, h_idx), take(self.ent_2, h_idx), take(self.ent_3, h_idx)
        t1, t2, t3 = take(self.ent_1, t_idx), take(self.ent_2, t_idx), take(self.ent_3, t_idx)
        r1, r2, r3 = take(self.rel_1, r_idx), take(self.rel_2, r_idx), take(self.rel_3, r_idx)
        return ((h1 * r1 * t3).sum(axis=1)
                + (h2 * r2 * t2).sum(axis=1)
                + (h3 * r3 * t1).sum(axis=1))


if __name__ == "__main__":
    ENT_TOTAL, REL_TOTAL, DIM = 50, 10, 32
    B = 200  # deliberately NOT a multiple of 128: exercises the padding path (pads to 256, grid=2)

    model = TriVecJax(ENT_TOTAL, REL_TOTAL, dim=DIM, seed=0)

    key = jax.random.PRNGKey(0)
    kh, kr, kt = jax.random.split(key, 3)
    h_idx = jax.random.randint(kh, (B,), 0, ENT_TOTAL, dtype=jnp.int32)
    r_idx = jax.random.randint(kr, (B,), 0, REL_TOTAL, dtype=jnp.int32)
    t_idx = jax.random.randint(kt, (B,), 0, ENT_TOTAL, dtype=jnp.int32)
    data = jnp.stack([h_idx, r_idx, t_idx], axis=1)  # [B, 3] = (head, rel, tail)

    score = jax.block_until_ready(model.forward(data))
    ref = model.forward_ref(data)

    assert score.shape == (B,), score.shape
    assert jnp.allclose(score, ref, atol=1e-5, rtol=1e-5), (score, ref)

    print("KERNEL_OK")
</pallas_src>

<mosaic_0001>
module attributes {stable_mosaic.version = 11 : i64} {
  func.func @_trivec_score_kernel(%arg0: i32, %arg1: memref<96x128xf32, #tpu.memory_space<vmem>>, %arg2: memref<96x128xf32, #tpu.memory_space<vmem>>, %arg3: memref<96x128xf32, #tpu.memory_space<vmem>>, %arg4: memref<1x128xf32, #tpu.memory_space<vmem>>) attributes {dimension_semantics = [#tpu.dimension_semantics<parallel>], iteration_bounds = array<i64: 2>, scalar_prefetch = 0 : i64, scratch_operands = 0 : i64, tpu.core_type = #tpu.core_type<tc>, window_params = [{transform_indices = @transform_0, window_bounds = array<i64: 96, 128>}, {transform_indices = @transform_1, window_bounds = array<i64: 96, 128>}, {transform_indices = @transform_2, window_bounds = array<i64: 96, 128>}, {transform_indices = @transform_3, window_bounds = array<i64: 1, 128>}]} {
    %c0 = arith.constant 0 : index
    %c0_0 = arith.constant 0 : index
    %0 = vector.load %arg1[%c0, %c0_0] : memref<96x128xf32, #tpu.memory_space<vmem>>, vector<96x128xf32>
    %c0_1 = arith.constant 0 : index
    %c0_2 = arith.constant 0 : index
    %1 = vector.load %arg2[%c0_1, %c0_2] : memref<96x128xf32, #tpu.memory_space<vmem>>, vector<96x128xf32>
    %2 = arith.mulf %0, %1 : vector<96x128xf32>
    %c0_3 = arith.constant 0 : index
    %c0_4 = arith.constant 0 : index
    %3 = vector.load %arg3[%c0_3, %c0_4] : memref<96x128xf32, #tpu.memory_space<vmem>>, vector<96x128xf32>
    %4 = arith.mulf %2, %3 : vector<96x128xf32>
    %cst = arith.constant dense<0.000000e+00> : vector<128xf32>
    %5 = vector.multi_reduction <add>, %4, %cst [0] : vector<96x128xf32> to vector<128xf32>
    %6 = vector.shape_cast %5 : vector<128xf32> to vector<1x128xf32>
    %c0_5 = arith.constant 0 : index
    %c0_6 = arith.constant 0 : index
    %7 = vector.load %arg4[%c0_5, %c0_6] : memref<1x128xf32, #tpu.memory_space<vmem>>, vector<1x128xf32>
    tpu.vector_store %arg4[%c0_5, %c0_6], %6 {strides = array<i32>} : memref<1x128xf32, #tpu.memory_space<vmem>>, vector<1x128xf32>,
    return
  }
  func.func @transform_0(%arg0: i32) -> (i32, i32) {
    %c0_i32 = arith.constant 0 : i32
    %c0_i32_0 = arith.constant 0 : i32
    return %c0_i32, %arg0 : i32, i32
  }
  func.func @transform_1(%arg0: i32) -> (i32, i32) {
    %c0_i32 = arith.constant 0 : i32
    %c0_i32_0 = arith.constant 0 : i32
    return %c0_i32, %arg0 : i32, i32
  }
  func.func @transform_2(%arg0: i32) -> (i32, i32) {
    %c0_i32 = arith.constant 0 : i32
    %c0_i32_0 = arith.constant 0 : i32
    return %c0_i32, %arg0 : i32, i32
  }
  func.func @transform_3(%arg0: i32) -> (i32, i32) {
    %c0_i32 = arith.constant 0 : i32
    %c0_i32_0 = arith.constant 0 : i32
    return %c0_i32, %arg0 : i32, i32
  }
}

</mosaic_0001>

<bundles_post_ra>
// kernel: tpu_custom_call.1
= control target key start
LH: loop header
LB: loop body
LE: loop exit
PB: predicated region body
PF: predicated region fallthrough
CT: control target
= control target key end

     0   :  { %s989_s0 = inlined_call_operand.hbm [shape: f32[96,256], index: 0, kind: input, shape index: {}]   ;;  %s990_s1 = inlined_call_operand.hbm [shape: f32[96,256], index: 1, kind: input, shape index: {}]   ;;  %s991_s2 = inlined_call_operand.hbm [shape: f32[96,256], index: 2, kind: input, shape index: {}]   ;;  %s992_s3 = inlined_call_operand.hbm [shape: f32[1,256], index: 3, kind: output, shape index: {}]  }
   0x1   :  { %1002 = sst [smem:[#allocation13_spill]] %s989_s0 }
   0x2   :  { %1003 = sst [smem:[#allocation14_spill]] %s990_s1 }
   0x3   :  { %8 = vsyncpa [#allocation3], 0 }
   0x4   :  { %10 = vsyncpa [#allocation3 + $0x1], 0 }
   0x5   :  { %11 = vsyncpa [#allocation6], 0 }
   0x6   :  { %13 = vsyncpa [#allocation6 + $0x1], 0 }
   0x7   :  { %14 = vsyncpa [#allocation4], 0 }
   0x8   :  { %16 = vsyncpa [#allocation4 + $0x1], 0  ;;  %s716_s12 = smov 0   ;;  %s718_s13 = smov 0  }
   0x9   :  { %s720_s14 = smov 0   ;;  %s722_s15 = smov 0  }
   0xa LB: > { %s737_s16 = sadd.s32 4294967295, %s687_s15   ;;  %s462_s17 = sadd.s32 4294967294, %s687_s15   ;;  %s687_s15 = sphi %s722_s15, %s1028_s15   ;;  %s683_s14 = sphi %s720_s14, %s1027_s14   ;;  %s679_s13 = sphi %s718_s13, %s1026_s13   ;;  %s675_s12 = sphi %s716_s12, %s1025_s12  }
   0xb   : > { %s741_s18 = sadd.s32 1, %s687_s15   ;;  %s29_s19 = sadd.s32 1, %s683_s14 }
   0xc   : > { %s26_s20 = ssub.s32 %s687_s15, %s741_s18  ;;  %p36_p0 = scmp.ne.s32.totalorder %s683_s14, %s679_s13 }
   0xd   : > { %p27_p1 = scmp.eq.s32.totalorder %s26_s20, 0  ;;  %p37_p2 = scmp.eq.s32.totalorder %s687_s15, 0 }
   0xe   : > { %p42_p3 = scmp.ne.s32.totalorder %s679_s13, %s675_s12  ;;  %p43_p4 = scmp.eq.s32.totalorder %s737_s16, 0 }
   0xf   : > { %s753_s21 = scalar_select %p27_p1, %s683_s14, %s29_s19  }
  0x10   : > { %p38_p5 = por %p37_p2, %p36_p0  ;;  %p755_p6 = por %p43_p4, %p42_p3 }
  0x11   : > { %1004 = sst [smem:[#allocation12_spill]] %s753_s21  ;;  %p118_p7 = scmp.eq.s32.totalorder %s737_s16, 1 }
  0x12   : > { %s1005_s22 = scalar_select %p755_p6, 1, 0 }
  0x13   : > { %p124_p8 = scmp.eq.s32.totalorder %s462_s17, 1  ;;  %p498_p10 = scmp.lt.s32.totalorder %s687_s15, 2 }
  0x14   : > { %p762_p11 = por %p118_p7, %p36_p0  ;;  %s995_s25 = sand.u32 1, %s683_s14  }
  0x15   : > { %p766_p12 = por %p124_p8, %p42_p3  ;;  %s772_s26 = sshll.u32 %s687_s15, 7 }
  0x16   : > { %s1006_s23 = scalar_select %p762_p11, 1, 0 }
  0x17   : > { %s1007_s24 = scalar_select %p766_p12, 1, 0 }
  0x18   : > { %s776_s27 = smul.u32 96, %s995_s25  ;;  %p778_p13 = pnand %p498_p10, %p38_p5 }
  0x19   : > { %s164_s29 = sand.u32 1, %s687_s15   ;;  %s1009_s1 = sld [smem:[#allocation14_spill]] }
  0x1a   : > { %s168_s6 = scalar_lea.vmem [#allocation5], %s776_s27  ;;  %s794_s8 = scalar_lea.sflag [#allocation6], %s164_s29 }
  0x1b   : > { %s174_s7 = sshll.u32 %s168_s6, 4  ;;  %p800_p3 = pneg %p778_p13  ;;  %s791_s7 = int_to_ptr.vmem [resolvable:$true] %s174_s7 }
  0x1f   : > { %s787_s5 = scalar_lea.hbm %s1009_s1, %s772_s26  ;;  %s540_s19 = scalar_lea.hbm %s1009_s1, 3072 }
  0x20   : > { %s535_s9 = scalar_lea.hbm %s787_s5, 1536  ;;  %p541_p7 = scmp.lt.s32.totalorder %s787_s5, %s1009_s1 }
  0x21   : > { %p536_p2 = scmp.ne.s32.totalorder %s787_s5, %s535_s9  ;;  %p542_p8 = scmp.lt.s32.totalorder %s540_s19, %s535_s9 }
  0x23   : > { %p538_p4 = pnand %p800_p3, %p536_p2  ;;  %p543_p10 = por %p542_p8, %p541_p7 }
  0x25   : > { %p539_p5 = pneg %p538_p4 }
  0x27   : > { %p544_p9 = pnand %p543_p10, %p539_p5 }
  0x29   : > { %547 = shalt.err (!%p544_p9)
}
  0x2a   : > { %s548_s29 = scalar_lea.vmem %s791_s7, 1536  ;;  %s689_s4 = smov [#allocation5]  }
  0x2b   : > { %p549_p0 = scmp.ne.s32.totalorder %s791_s7, %s548_s29  ;;  %s553_s6 = sshll.u32 %s689_s4, 4  ;;  %s554_s6 = int_to_ptr.vmem [resolvable:$false] %s553_s6 }
  0x2c   : > { %s555_s11 = scalar_lea.vmem %s554_s6, 3072  ;;  %p556_p1 = scmp.lt.s32.totalorder %s791_s7, %s554_s6 }
  0x2d   : > { %p551_p2 = pnand %p549_p0, %p800_p3  ;;  %p557_p12 = scmp.lt.s32.totalorder %s555_s11, %s548_s29 }
  0x2f   : > { %p552_p4 = pneg %p551_p2  ;;  %p558_p11 = por %p557_p12, %p556_p1 }
  0x31   : > { %p559_p6 = pnand %p558_p11, %p552_p4 }
  0x33   : > { %562 = shalt.err (!%p559_p6)
}
  0x34   : > { %s996_s9 = smov 256   ;;  %s998_s17 = smov 128  }
  0x35   : > { %s1000_s19 = smov 8   ;;  %p1011_p6 = scmp.lt.s32.totalorder %s687_s15, 3 }
  0x36   : > { %490 = dma.hbm_to_vmem [thread:$0]  (!%p778_p13), %s787_s5, 1536, %s791_s7, %s794_s8, %s996_s9, %s998_s17, %s1000_s19  }
  0x37   : > { %p1012_p9 = scmp.ge.s32.totalorder %s687_s15, 1  ;;  %s1014_s0 = sld [smem:[#allocation13_spill]] }
  0x38   : > { %s148_s6 = scalar_lea.vmem [#allocation2], %s776_s27  ;;  %s847_s7 = scalar_lea.hbm %s991_s2, %s772_s26 }
  0x39   : > { %p830_p11 = pnand %p1012_p9, %p1011_p6  ;;  %s154_s11 = sshll.u32 %s148_s6, 4  ;;  %s841_s11 = int_to_ptr.vmem [resolvable:$true] %s154_s11 }
  0x3a   : > { %s1015_s9 = sand.u32 1, %s683_s14  }
  0x3b   : > { %s1013_s20 = scalar_select %p830_p11, 1, 0 }
  0x3c   : > { %s145_s17 = scalar_lea.sflag [#allocation3], %s1015_s9 }
  0x3d   : > { %s838_s4 = scalar_lea.hbm %s1014_s0, %s772_s26  ;;  %s568_s1 = scalar_lea.hbm %s1014_s0, 3072 }
  0x3e   : > { %s563_s19 = scalar_lea.hbm %s838_s4, 1536  ;;  %p569_p5 = scmp.lt.s32.totalorder %s838_s4, %s1014_s0 }
  0x3f   : > { %p564_p12 = scmp.ne.s32.totalorder %s838_s4, %s563_s19  ;;  %p570_p7 = scmp.lt.s32.totalorder %s568_s1, %s563_s19 }
  0x41   : > { %p566_p0 = pnand %p564_p12, %p800_p3  ;;  %p571_p8 = por %p570_p7, %p569_p5 }
  0x43   : > { %p567_p1 = pneg %p566_p0 }
  0x45   : > { %p572_p10 = pnand %p571_p8, %p567_p1 }
  0x47   : > { %575 = shalt.err (!%p572_p10)
}
  0x48   : > { %s576_s25 = scalar_lea.vmem %s841_s11, 1536  ;;  %s693_s26 = smov [#allocation2]  }
  0x49   : > { %p577_p2 = scmp.ne.s32.totalorder %s841_s11, %s576_s25  ;;  %s581_s9 = sshll.u32 %s693_s26, 4  ;;  %s582_s9 = int_to_ptr.vmem [resolvable:$false] %s581_s9 }
  0x4a   : > { %s583_s5 = scalar_lea.vmem %s582_s9, 3072  ;;  %p584_p9 = scmp.lt.s32.totalorder %s841_s11, %s582_s9 }
  0x4b   : > { %p579_p4 = pnand %p577_p2, %p800_p3  ;;  %p585_p12 = scmp.lt.s32.totalorder %s583_s5, %s576_s25 }
  0x4d   : > { %p580_p6 = pneg %p579_p4  ;;  %p586_p0 = por %p585_p12, %p584_p9 }
  0x4f   : > { %p587_p11 = pnand %p586_p0, %p580_p6 }
  0x51   : > { %590 = shalt.err (!%p587_p11)
}
  0x52   : > { %s1016_s1 = smov 8   ;;  %s1017_s21 = smov 128  }
  0x53   : > { %s1018_s19 = smov 256   ;;  %s188_s30 = scalar_lea.vmem [#allocation7], %s776_s27 }
  0x54   : > { %487 = dma.hbm_to_vmem [thread:$0]  (!%p778_p13), %s838_s4, 1536, %s841_s11, %s145_s17, %s1018_s19, %s1017_s21, %s1016_s1  }
  0x55   : > { %s194_s29 = sshll.u32 %s188_s30, 4  ;;  %s591_s6 = scalar_lea.hbm %s847_s7, 1536  ;;  %s195_s29 = int_to_ptr.vmem [resolvable:$true] %s194_s29 }
  0x56   : > { %p592_p1 = scmp.ne.s32.totalorder %s847_s7, %s591_s6  ;;  %s596_s9 = scalar_lea.hbm %s991_s2, 3072 }
  0x57   : > { %p597_p7 = scmp.lt.s32.totalorder %s847_s7, %s991_s2  ;;  %p598_p8 = scmp.lt.s32.totalorder %s596_s9, %s591_s6 }
  0x58   : > { %p594_p11 = pnand %p592_p1, %p800_p3 }
  0x59   : > { %p599_p10 = por %p598_p8, %p597_p7 }
  0x5a   : > { %p595_p5 = pneg %p594_p11 }
  0x5c   : > { %p600_p2 = pnand %p599_p10, %p595_p5 }
  0x5e   : > { %603 = shalt.err (!%p600_p2)
}
  0x5f   : > { %s604_s27 = scalar_lea.vmem %s195_s29, 1536  ;;  %s694_s17 = smov [#allocation7]  }
  0x60   : > { %p605_p4 = scmp.ne.s32.totalorder %s195_s29, %s604_s27  ;;  %s609_s4 = sshll.u32 %s694_s17, 4  ;;  %s610_s4 = int_to_ptr.vmem [resolvable:$false] %s609_s4 }
  0x61   : > { %s611_s11 = scalar_lea.vmem %s610_s4, 3072  ;;  %p612_p12 = scmp.lt.s32.totalorder %s195_s29, %s610_s4 }
  0x62   : > { %p607_p6 = pnand %p605_p4, %p800_p3  ;;  %p613_p0 = scmp.lt.s32.totalorder %s611_s11, %s604_s27 }
  0x64   : > { %p608_p9 = pneg %p607_p6  ;;  %p614_p1 = por %p613_p0, %p612_p12 }
  0x66   : > { %p615_p11 = pnand %p614_p1, %p608_p9 }
  0x68   : > { %618 = shalt.err (!%p615_p11)
}
  0x69   : > { %493 = dma.hbm_to_vmem [thread:$0]  (!%p778_p13), %s847_s7, 1536, %s195_s29, %s794_s8, %s1018_s19, %s1017_s21, %s1016_s1  }
  0x6a   : > { %p1019_p3 = scmp.ne.s32.totalorder %s1013_s20, 0 }
  0x6b   : > { %s898_s0 = sand.u32 (!%p1019_p3), 1, %s679_s13   ;;  %p1020_p5 = scmp.ne.s32.totalorder (!%p1019_p3), %s1005_s22, 0 }
  0x6c   : > { %206 = sbr.rel (%p1019_p3) target bundleno = 172 (0xac), region = 32  ;;  %s209_s30 = scalar_lea.sflag (!%p1019_p3), [#allocation3], %s898_s0 }
  0x6d   : > { %s475_s10 = smul.u32 (!%p1019_p3), 96, %s898_s0 }
  0x6f   : > { %s902_s6 = scalar_lea.vmem (!%p1019_p3), [#allocation2], %s475_s10 }
  0x71   : > { %662 = dma.done.wait (%p1020_p5), %s209_s30, 1536  }
  0x72   : > { %664 = vsyncadd (%p1020_p5), %s209_s30, 4294965760  ;;  %s217_s28 = sand.u32 1, %s737_s16   ;;  %s909_s20 = scalar_lea.vmem [#allocation5], %s475_s10 }
  0x73   : > { %s218_s8 = scalar_lea.sflag [#allocation6], %s217_s28 }
  0x74   : > { %666 = dma.done.wait (%p1020_p5), %s218_s8, 3072  }
  0x75   : > { %668 = vsyncadd (%p1020_p5), %s218_s8, 4294964224  ;;  %v262_v0 = vld [vmem:[%s902_s6] sm:$0xff]  ;;  %v263_v1 = vld [vmem:[%s902_s6 + $0x8] sm:$0xff]  ;;  %s927_s22 = scalar_lea.vmem [#allocation7], %s475_s10  ;;  %s261_s7 = scalar_lea.vmem [#allocation8], %s898_s0 }
  0x76   : > { %v264_v2 = vld [vmem:[%s902_s6 + $0x10] sm:$0xff]  ;;  %v265_v3 = vld [vmem:[%s902_s6 + $0x18] sm:$0xff]  ;;  %v274_v4 = vld [vmem:[%s909_s20] sm:$0xff]  ;;  %s353_s1 = sshll.u32 %s261_s7, 4  ;;  %s469_s21 = sshll.u32 %s737_s16, 4  ;;  %s354_s1 = int_to_ptr.vmem [resolvable:$true] %s353_s1 }
  0x77   : > { %v275_v5 = vld [vmem:[%s909_s20 + $0x8] sm:$0xff]  ;;  %v276_v6 = vld [vmem:[%s909_s20 + $0x10] sm:$0xff]  ;;  %v277_v7 = vld [vmem:[%s909_s20 + $0x18] sm:$0xff]  ;;  %v286_v8 = vmul.f32 %v274_v4, %v262_v0  ;;  %s351_s25 = scalar_lea.hbm %s992_s3, %s469_s21  ;;  %s341_s26 = scalar_lea.sflag [#allocation4], %s898_s0 }
  0x78   : > { %v287_v9 = vmul.f32 %v275_v5, %v263_v1  ;;  %v288_v10 = vmul.f32 %v276_v6, %v264_v2  ;;  %v266_v11 = vld [vmem:[%s902_s6 + $0x20] sm:$0xff]  ;;  %v267_v13 = vld [vmem:[%s902_s6 + $0x28] sm:$0xff]  ;;  %v289_v15 = vmul.f32 %v277_v7, %v265_v3  ;;  %v300_v18 = vld [vmem:[%s927_s22 + $0x10] sm:$0xff]  ;;  %s619_s9 = scalar_lea.vmem %s354_s1, 16  ;;  %p1021_p7 = scmp.ne.s32.totalorder %s1006_s23, 0 }
  0x79   : > { %v278_v12 = vld [vmem:[%s909_s20 + $0x20] sm:$0xff]  ;;  %v279_v14 = vld [vmem:[%s909_s20 + $0x28] sm:$0xff]  ;;  %v301_v20 = vld [vmem:[%s927_s22 + $0x18] sm:$0xff]  ;;  %p620_p13 = scmp.ne.s32.totalorder %s354_s1, %s619_s9  ;;  %s695_s5 = smov [#allocation8]  }
  0x7a   : > { %v298_v16 = vld [vmem:[%s927_s22] sm:$0xff]  ;;  %v299_v17 = vld [vmem:[%s927_s22 + $0x8] sm:$0xff]  ;;  %v290_v19 = vmul.f32 %v278_v12, %v266_v11  ;;  %v312_v23 = vmul.f32 %v300_v18, %v288_v10  ;;  %v268_v24 = vld [vmem:[%s902_s6 + $0x30] sm:$0xff]  ;;  %v291_v27 = vmul.f32 %v279_v14, %v267_v13  ;;  %v313_v28 = vmul.f32 %v301_v20, %v289_v15  ;;  %s623_s27 = sshll.u32 %s695_s5, 4  ;;  %s624_s27 = int_to_ptr.vmem [resolvable:$false] %s623_s27 }
  0x7b   : > { %v310_v21 = vmul.f32 %v298_v16, %v286_v8  ;;  %v311_v22 = vmul.f32 %v299_v17, %v287_v9  ;;  %v280_v25 = vld [vmem:[%s909_s20 + $0x30] sm:$0xff]  ;;  %v302_v26 = vld [vmem:[%s927_s22 + $0x20] sm:$0xff]  ;;  %v269_v30 = vld [vmem:[%s902_s6 + $0x38] sm:$0xff]  ;;  %p621_p8 = pnand %p620_p13, %p1021_p7  ;;  %s625_s17 = scalar_lea.vmem %s624_s27, 32 }
  0x7c   : > { %v281_v31 = vld [vmem:[%s909_s20 + $0x38] sm:$0xff]  ;;  %v303_v32 = vld [vmem:[%s927_s22 + $0x28] sm:$0xff]  ;;  %v292_v33 = vmul.f32 %v280_v25, %v268_v24  ;;  %v314_v34 = vmul.f32 %v302_v26, %v290_v19  ;;  %v270_v36 = vld [vmem:[%s902_s6 + $0x40] sm:$0xff]  ;;  %p626_p2 = scmp.lt.s32.totalorder %s354_s1, %s624_s27  ;;  %p627_p4 = scmp.lt.s32.totalorder %s625_s17, %s619_s9 }
  0x7d   : > { %v322_v29 = vadd.f32 %v311_v22, %v310_v21  ;;  %v282_v37 = vld [vmem:[%s909_s20 + $0x40] sm:$0xff]  ;;  %v304_v38 = vld [vmem:[%s927_s22 + $0x30] sm:$0xff]  ;;  %v293_v39 = vmul.f32 %v281_v31, %v269_v30  ;;  %v315_v40 = vmul.f32 %v303_v32, %v291_v27  ;;  %v271_v42 = vld [vmem:[%s902_s6 + $0x48] sm:$0xff]  ;;  %p622_p10 = pneg %p621_p8 }
  0x7e   : > { %v283_v43 = vld [vmem:[%s909_s20 + $0x48] sm:$0xff]  ;;  %v305_v44 = vld [vmem:[%s927_s22 + $0x38] sm:$0xff]  ;;  %v294_v45 = vmul.f32 %v282_v37, %v270_v36  ;;  %v316_v46 = vmul.f32 %v304_v38, %v292_v33  ;;  %v272_v48 = vld [vmem:[%s902_s6 + $0x50] sm:$0xff]  ;;  %p628_p6 = por %p627_p4, %p626_p2 }
  0x7f   : > { %v323_v35 = vadd.f32 %v322_v29, %v312_v23  ;;  %v284_v49 = vld [vmem:[%s909_s20 + $0x50] sm:$0xff]  ;;  %v306_v50 = vld [vmem:[%s927_s22 + $0x40] sm:$0xff]  ;;  %v295_v51 = vmul.f32 %v283_v43, %v271_v42  ;;  %v317_v52 = vmul.f32 %v305_v44, %v293_v39  ;;  %v273_v54 = vld [vmem:[%s902_s6 + $0x58] sm:$0xff] }
  0x80   : > { %v285_v55 = vld [vmem:[%s909_s20 + $0x58] sm:$0xff]  ;;  %v307_v56 = vld [vmem:[%s927_s22 + $0x48] sm:$0xff]  ;;  %v296_v57 = vmul.f32 %v284_v49, %v272_v48  ;;  %v318_v58 = vmul.f32 %v306_v50, %v294_v45  ;;  %v308_v60 = vld [vmem:[%s927_s22 + $0x50] sm:$0xff]  ;;  %p629_p9 = pnand %p628_p6, %p622_p10 }
  0x81   : > { %v324_v41 = vadd.f32 %v323_v35, %v313_v28  ;;  %v297_v61 = vmul.f32 %v285_v55, %v273_v54  ;;  %v319_v62 = vmul.f32 %v307_v56, %v295_v51  ;;  %v309_v0 = vld [vmem:[%s927_s22 + $0x58] sm:$0xff] }
  0x82   : > { %v320_v1 = vmul.f32 %v308_v60, %v296_v57 }
  0x83   : > { %v325_v47 = vadd.f32 %v324_v41, %v314_v34  ;;  %v321_v3 = vmul.f32 %v309_v0, %v297_v61 }
  0x85   : > { %v326_v53 = vadd.f32 %v325_v47, %v315_v40 }
  0x87   : > { %v327_v59 = vadd.f32 %v326_v53, %v316_v46 }
  0x89   : > { %v328_v63 = vadd.f32 %v327_v59, %v317_v52 }
  0x8b   : > { %v329_v2 = vadd.f32 %v328_v63, %v318_v58 }
  0x8d   : > { %v330_v4 = vadd.f32 %v329_v2, %v319_v62 }
  0x8f   : > { %v331_v5 = vadd.f32 %v330_v4, %v320_v1 }
  0x91   : > { %v332_v6 = vadd.f32 %v331_v5, %v321_v3 }
  0x93   : > { %v333_v7 = vrot.slane %v332_v6, 4 }
  0x95   : > { %v334_v8 = vadd.f32 %v333_v7, %v332_v6 }
  0x97   : > { %v335_v9 = vrot.slane %v334_v8, 2 }
  0x99   : > { %v336_v10 = vadd.f32 %v335_v9, %v334_v8 }
  0x9b   : > { %v337_v11 = vrot.slane %v336_v10, 1 }
  0x9d   : > { %v338_v12 = vadd.f32 %v337_v11, %v336_v10 }
  0x9f   : > { %339 = vst [vmem:[%s261_s7] sm:$0x1] %v338_v12 }
  0xa0   : > { %632 = shalt.err (!%p629_p9)
}
  0xa1   : > { %s633_s16 = scalar_lea.hbm %s351_s25, 16  ;;  %s637_s0 = scalar_lea.hbm %s992_s3, 32 }
  0xa2   : > { %p634_p12 = scmp.ne.s32.totalorder %s351_s25, %s633_s16  ;;  %p638_p11 = scmp.lt.s32.totalorder %s351_s25, %s992_s3 }
  0xa3   : > { %p639_p3 = scmp.lt.s32.totalorder %s637_s0, %s633_s16 }
  0xa4   : > { %p635_p0 = pnand %p634_p12, %p1021_p7 }
  0xa5   : > { %p640_p5 = por %p639_p3, %p638_p11 }
  0xa6   : > { %p636_p1 = pneg %p635_p0 }
  0xa8   : > { %p641_p13 = pnand %p640_p5, %p636_p1 }
  0xaa   : > { %644 = shalt.err (!%p641_p13)
}
  0xab   : > { %482 = dma.vmem_to_hbm [thread:$0]  (%p1021_p7), %s354_s1, 16, %s351_s25, %s341_s26  }
  0xac PF: > { %s365_s6 = sand.u32 1, %s675_s12   ;;  %p1022_p8 = scmp.ne.s32.totalorder %s1007_s24, 0 }
  0xad   : > { %p1023_p10 = scmp.ge.s32.totalorder %s687_s15, 2  ;;  %s366_s28 = scalar_lea.sflag [#allocation4], %s365_s6 }
  0xaf   : > { %p495_p2 = pnand %p1023_p10, %p1022_p8 }
  0xb1   : > { %p496_p4 = pneg %p495_p2 }
  0xb3   : > { %670 = dma.done.wait (%p496_p4), %s366_s28, 16  }
  0xb4   : > { %672 = vsyncadd (%p496_p4), %s366_s28, 4294967280  ;;  %s1024_s8 = sld [smem:[#allocation12_spill]]  ;;  %p19_p6 = scmp.ge.s32.totalorder %s741_s18, 4  }
  0xb5   : > { %s1025_s12 = smov %s679_s13  ;;  %s1026_s13 = smov %s683_s14 }
  0xb6   : > { %s1028_s15 = smov %s741_s18  ;;  %21 = sbr.rel (!%p19_p6) target bundleno = 10 (0xa), region = 101 }
  0xba   : > { %s1027_s14 = smov %s1024_s8 }
  0xbb   :  { %370 = vsyncpa [#allocation3], 1 }
  0xbc   :  { %372 = vsyncpa [#allocation3 + $0x1], 1 }
  0xbd   :  { %373 = vsyncpa [#allocation6], 1 }
  0xbe   :  { %375 = vsyncpa [#allocation6 + $0x1], 1 }
  0xbf   :  { %376 = vsyncpa [#allocation4], 1 }
  0xc0   :  { %378 = vsyncpa [#allocation4 + $0x1], 1 }

</bundles_post_ra>
